<compile_context>
chip_gen: v7x
topology: tpu7x:2x2x1
jax: 0.10.0
libtpu: 0.0.40
codegen_flags: <defaults>
</compile_context>

<pallas_src>
import functools

import jax
import jax.numpy as jnp
from jax import lax
from jax.experimental import pallas as pl
from jax.experimental.pallas import tpu as pltpu


def _pair(v):
    if isinstance(v, (tuple, list)):
        return int(v[0]), int(v[1])
    return int(v), int(v)


def _maxpool_kernel(x_ref, o_ref, *, kh, kw, sh, sw, dh, dw, ch):
    """Max-pool one block.

    x_ref: (HB, WQ, sw*ch)  with HB = sh*(TH + qi_max); the column residue
                            (w % sw) already lives on the lane axis.
    o_ref: (TH, WO, ch)
    """
    th, wo, _ = o_ref.shape
    hb = x_ref.shape[0]
    x = x_ref[...]
    # Split the leading (row) dim into (row_quotient, row_residue).  This is a
    # leading-dim-only reshape: layout preserving, no relayout / data movement.
    xh = x.reshape(hb // sh, sh, *x.shape[1:])

    slabs = []
    for i in range(kh):                       # static, tiny unroll (kh*kw slabs)
        qi, ri = divmod(i * dh, sh)
        xi = xh[qi:qi + th, ri]               # (TH, WQ, sw*ch)
        for j in range(kw):
            qj, rj = divmod(j * dw, sw)
            # rows:  r*sh + i*dh ; cols: ow*sw + j*dw ; channels untouched.
            slabs.append(xi[:, qj:qj + wo, rj * ch:(rj + 1) * ch])  # (TH, WO, ch)

    # Balanced max tree: log2(kh*kw) VPU dependency depth instead of a chain.
    while len(slabs) > 1:
        nxt = [jnp.maximum(slabs[a], slabs[a + 1])
               for a in range(0, len(slabs) - 1, 2)]
        if len(slabs) % 2:
            nxt.append(slabs[-1])
        slabs = nxt

    o_ref[...] = slabs[0]                     # one full-block store


def complex_max_pool2d(x, kernel_size, stride=None, padding=0, dilation=1):
    B, two, C, H, W = x.shape
    assert two == 2, "dim 1 must hold (real, imag)"
    kh, kw = _pair(kernel_size)
    sh, sw = _pair(stride) if stride is not None else (kh, kw)
    ph, pw = _pair(padding)
    dh, dw = _pair(dilation)
    dtype = x.dtype

    Ho = (H + 2 * ph - dh * (kh - 1) - 1) // sh + 1
    Wo = (W + 2 * pw - dw * (kw - 1) - 1) // sw + 1
    L = B * 2 * C

    if jnp.issubdtype(dtype, jnp.floating):
        pad_val = -jnp.inf                       # PyTorch max-pool pad identity
    else:
        pad_val = jnp.iinfo(dtype).min           # dtype-safe identity for ints

    # ---- layout: (B,2,C,H,W) -> channels-last (H, W, L), L = B*2*C ----------
    xt = jnp.transpose(x, (3, 4, 0, 1, 2)).reshape(H, W, L)
    if ph or pw:
        xt = jnp.pad(xt, ((ph, ph), (pw, pw), (0, 0)), constant_values=pad_val)
    H_eff = H + 2 * ph
    W_eff = W + 2 * pw

    # Normalize the W extent to exactly sw*(Wo + qj_max) so the stride residue
    # can be folded onto the lane axis by a *free* (contiguous) reshape.
    # Columns beyond the last valid window are never read by the kernel.
    qj_max = (dw * (kw - 1)) // sw
    w_need = sw * (Wo + qj_max)
    if W_eff > w_need:
        xt = xt[:, :w_need, :]
    elif W_eff < w_need:
        xt = jnp.pad(xt, ((0, 0), (0, w_need - W_eff), (0, 0)),
                     constant_values=pad_val)
    wq = w_need // sw
    xk = xt.reshape(H_eff, wq, sw * L)           # free reshape (contiguous)

    # ---- H tiling: ~2 MiB input blocks when row tiles are independent -------
    qi_max = (dh * (kh - 1)) // sh
    itemsize = jnp.dtype(dtype).itemsize
    if qi_max == 0:                              # row tiles need no halo
        target = 2 * 1024 * 1024
        row_bytes = sh * wq * sw * L * itemsize  # input bytes per output row
        th = max(1, min(Ho, target // max(row_bytes, 1)))
    else:
        # Overlapping row tiles would need halo rows; use a single H block.
        th = Ho
    nh = -(-Ho // th)                            # cdiv
    hb = sh * (th + qi_max)                      # input rows per block

    kern = functools.partial(_maxpool_kernel, kh=kh, kw=kw, sh=sh, sw=sw,
                             dh=dh, dw=dw, ch=L)
    out = pl.pallas_call(
        kern,
        out_shape=jax.ShapeDtypeStruct((Ho, Wo, L), dtype),
        grid=(nh,),
        in_specs=[pl.BlockSpec((hb, wq, sw * L), lambda h: (h, 0, 0))],
        out_specs=pl.BlockSpec((th, Wo, L), lambda h: (h, 0, 0)),
        compiler_params=pltpu.CompilerParams(
            dimension_semantics=("parallel",),
            vmem_limit_bytes=32 * 1024 * 1024),
    )(xk)

    # back to (B, 2, C, Ho, Wo): free reshape + one transpose.
    return out.reshape(Ho, Wo, B, 2, C).transpose(2, 3, 4, 0, 1)


class ComplexMaxPool2d:
    """JAX/Pallas equivalent of the PyTorch ComplexMaxPool2d module."""

    def __init__(self, kernel_size, stride=None, padding=0, dilation=1,
                 return_indices=False, ceil_mode=False):
        self.kernel_size = kernel_size
        self.stride = stride
        self.padding = padding
        self.dilation = dilation
        if return_indices:
            # TODO(synk): return_indices (argmax index output) not implemented.
            raise NotImplementedError("return_indices is not supported")
        if ceil_mode:
            # TODO(synk): ceil_mode output-size rounding not implemented.
            raise NotImplementedError("ceil_mode is not supported")

    def __call__(self, x):
        return complex_max_pool2d(x, self.kernel_size, self.stride,
                                  self.padding, self.dilation)


if __name__ == "__main__":
    key = jax.random.PRNGKey(0)
    B, C, H, W = 2, 4, 16, 16
    x = jax.random.normal(key, (B, 2, C, H, W), dtype=jnp.float32)

    # Default case: stride=None -> stride = kernel_size.
    pool = ComplexMaxPool2d(kernel_size=2)
    y = pool(x)
    jax.block_until_ready(y)
    ref = lax.reduce_window(x, -jnp.inf, lax.max,
                            window_dimensions=(1, 1, 1, 2, 2),
                            window_strides=(1, 1, 1, 2, 2),
                            padding="VALID")
    assert y.shape == (B, 2, C, H // 2, W // 2), y.shape
    assert jnp.array_equal(y, ref), "mismatch vs reference (k=2, s=2)"

    # Overlapping windows + padding path.
    pool2 = ComplexMaxPool2d(kernel_size=3, stride=2, padding=1)
    y2 = pool2(x)
    jax.block_until_ready(y2)
    ref2 = lax.reduce_window(x, -jnp.inf, lax.max,
                             window_dimensions=(1, 1, 1, 3, 3),
                             window_strides=(1, 1, 1, 2, 2),
                             padding=((0, 0), (0, 0), (0, 0), (1, 1), (1, 1)))
    assert y2.shape == (B, 2, C, 8, 8), y2.shape
    assert jnp.array_equal(y2, ref2), "mismatch vs reference (k=3, s=2, p=1)"

    print("KERNEL_OK")
</pallas_src>

<mosaic_0001>
module attributes {stable_mosaic.version = 11 : i64} {
  func.func @_maxpool_kernel(%arg0: i32, %arg1: memref<16x8x32xf32, #tpu.memory_space<vmem>>, %arg2: memref<8x8x16xf32, #tpu.memory_space<vmem>>) attributes {dimension_semantics = [#tpu.dimension_semantics<parallel>], iteration_bounds = array<i64: 1>, scalar_prefetch = 0 : i64, scratch_operands = 0 : i64, tpu.core_type = #tpu.core_type<tc>, window_params = [{transform_indices = @transform_0, window_bounds = array<i64: 16, 8, 32>}, {transform_indices = @transform_1, window_bounds = array<i64: 8, 8, 16>}]} {
    %c0 = arith.constant 0 : index
    %c0_0 = arith.constant 0 : index
    %c0_1 = arith.constant 0 : index
    %0 = vector.load %arg1[%c0, %c0_0, %c0_1] : memref<16x8x32xf32, #tpu.memory_space<vmem>>, vector<16x8x32xf32>
    %1 = vector.shape_cast %0 : vector<16x8x32xf32> to vector<8x2x8x32xf32>
    %2 = vector.extract_strided_slice %1 {offsets = [0, 0, 0, 0], sizes = [8, 1, 8, 32], strides = [1, 1, 1, 1]} : vector<8x2x8x32xf32> to vector<8x1x8x32xf32>
    %3 = vector.shape_cast %2 : vector<8x1x8x32xf32> to vector<8x8x32xf32>
    %4 = vector.extract_strided_slice %3 {offsets = [0, 0, 0], sizes = [8, 8, 16], strides = [1, 1, 1]} : vector<8x8x32xf32> to vector<8x8x16xf32>
    %5 = vector.extract_strided_slice %3 {offsets = [0, 0, 16], sizes = [8, 8, 16], strides = [1, 1, 1]} : vector<8x8x32xf32> to vector<8x8x16xf32>
    %6 = vector.extract_strided_slice %1 {offsets = [0, 1, 0, 0], sizes = [8, 1, 8, 32], strides = [1, 1, 1, 1]} : vector<8x2x8x32xf32> to vector<8x1x8x32xf32>
    %7 = vector.shape_cast %6 : vector<8x1x8x32xf32> to vector<8x8x32xf32>
    %8 = vector.extract_strided_slice %7 {offsets = [0, 0, 0], sizes = [8, 8, 16], strides = [1, 1, 1]} : vector<8x8x32xf32> to vector<8x8x16xf32>
    %9 = vector.extract_strided_slice %7 {offsets = [0, 0, 16], sizes = [8, 8, 16], strides = [1, 1, 1]} : vector<8x8x32xf32> to vector<8x8x16xf32>
    %10 = arith.maximumf %4, %5 : vector<8x8x16xf32>
    %11 = arith.maximumf %8, %9 : vector<8x8x16xf32>
    %12 = arith.maximumf %10, %11 : vector<8x8x16xf32>
    %c0_2 = arith.constant 0 : index
    %c0_3 = arith.constant 0 : index
    %c0_4 = arith.constant 0 : index
    %13 = vector.load %arg2[%c0_2, %c0_3, %c0_4] : memref<8x8x16xf32, #tpu.memory_space<vmem>>, vector<8x8x16xf32>
    tpu.vector_store %arg2[%c0_2, %c0_3, %c0_4], %12 {strides = array<i32>} : memref<8x8x16xf32, #tpu.memory_space<vmem>>, vector<8x8x16xf32>,
    return
  }
  func.func @transform_0(%arg0: i32) -> (i32, i32, i32) {
    %c0_i32 = arith.constant 0 : i32
    %c0_i32_0 = arith.constant 0 : i32
    %c0_i32_1 = arith.constant 0 : i32
    return %arg0, %c0_i32, %c0_i32_0 : i32, i32, i32
  }
  func.func @transform_1(%arg0: i32) -> (i32, i32, i32) {
    %c0_i32 = arith.constant 0 : i32
    %c0_i32_0 = arith.constant 0 : i32
    %c0_i32_1 = arith.constant 0 : i32
    return %arg0, %c0_i32, %c0_i32_0 : i32, i32, i32
  }
}

</mosaic_0001>

<bundles_post_ra>
// kernel: tpu_custom_call.1
= control target key start
LH: loop header
LB: loop body
LE: loop exit
PB: predicated region body
PF: predicated region fallthrough
CT: control target
= control target key end

     0   :  { %6 = vsyncpa [#allocation3], 0  ;;  %s267_s0 = inlined_call_operand.hbm [shape: f32[16,8,32], index: 0, kind: input, shape index: {}]   ;;  %s268_s1 = inlined_call_operand.hbm [shape: f32[8,8,16], index: 1, kind: output, shape index: {}]  }
   0x1   :  { %7 = vsyncpa [#allocation4], 0  ;;  %s206_s6 = smov [#allocation2]   ;;  %s158_s10 = scalar_lea.hbm %s267_s0, 2048 }
   0x2   :  { %s13_s7 = sshll.u32 %s206_s6, 4  ;;  %p159_p0 = scmp.ne.s32.totalorder %s267_s0, %s158_s10  ;;  %s14_s7 = int_to_ptr.vmem [resolvable:$true] %s13_s7 }
   0x3   :  { %p162_p1 = scmp.lt.u32.totalorder %s158_s10, %s267_s0 }
   0x5   :  { %p164_p2 = pnand %p162_p1, %p159_p0 }
   0x7   :  { %167 = shalt.err (!%p164_p2)
}
   0x8   :  { %s168_s15 = scalar_lea.vmem %s14_s7, 2048  ;;  %p173_p4 = scmp.lt.s32.totalorder %s14_s7, %s14_s7 }
   0x9   :  { %p169_p3 = scmp.ne.s32.totalorder %s14_s7, %s168_s15  ;;  %p174_p5 = scmp.lt.s32.totalorder %s168_s15, %s168_s15 }
   0xb   :  { %p175_p6 = por %p174_p5, %p173_p4 }
   0xd   :  { %p176_p7 = pnand %p175_p6, %p169_p3 }
   0xf   :  { %179 = shalt.err (!%p176_p7)
}
  0x10   :  { %s207_s16 = smov 128   ;;  %s208_s17 = smov 8  }
  0x11   :  { %19 = dma.hbm_to_vmem [thread:$0]  %s267_s0, 2048, %s14_s7, [#allocation3], %s207_s16, %s207_s16, %s208_s17  }
  0x12   :  { %202 = dma.done.wait [#allocation3], 2048  }
  0x13   :  { %203 = vsyncadd [#allocation3], 4294965248  ;;  %v27_v0 = vld [vmem:[#allocation2 + $0x20] sm:$0xff]  ;;  %s209_s20 = smov 112   ;;  %v29_v2 = vld [vmem:[#allocation2 + $0x30] sm:$0xff]  ;;  %vm127_vm0 = vcmask 130048  }
  0x14   :  { %v23_v1 = vld [vmem:[#allocation2] sm:$0xff]  ;;  %51 = vrot.lane.b32.xlu1 %v27_v0, %s209_s20  ;;  %v25_v3 = vld [vmem:[#allocation2 + $0x10] sm:$0xff]  ;;  %v26_v8 = vld [vmem:[#allocation2 + $0x18] sm:$0xff]  ;;  %s210_s0 = smov [#allocation5]  }
  0x15   :  { %47 = vrot.lane.b32.xlu0 %v23_v1, %s209_s20  ;;  %v33_v4 = vld [vmem:[#allocation2 + $0x50] sm:$0xff]  ;;  %v31_v5 = vld [vmem:[#allocation2 + $0x40] sm:$0xff]  ;;  %v24_v9 = vld [vmem:[#allocation2 + $0x8] sm:$0xff]  ;;  %s141_s21 = sshll.u32 %s210_s0, 4  ;;  %s142_s21 = int_to_ptr.vmem [resolvable:$true] %s141_s21 }
  0x16   :  { %v236_v6 = vld [vmem:[#allocation2 + $0x70] sm:$0xff]  ;;  %v238_v7 = vld [vmem:[#allocation2 + $0x60] sm:$0xff]  ;;  %v30_v10 = vld [vmem:[#allocation2 + $0x38] sm:$0xff]  ;;  %s180_s22 = scalar_lea.vmem %s142_s21, 1024  ;;  %p185_p9 = scmp.lt.s32.totalorder %s142_s21, %s142_s21 }
  0x17   :  { %v28_v11 = vld [vmem:[#allocation2 + $0x28] sm:$0xff]  ;;  %v34_v12 = vld [vmem:[#allocation2 + $0x58] sm:$0xff]  ;;  %p181_p8 = scmp.ne.s32.totalorder %s142_s21, %s180_s22  ;;  %p186_p10 = scmp.lt.s32.totalorder %s180_s22, %s180_s22 }
  0x18   :  { %53 = vrot.lane.b32.xlu1 %v29_v2, %s209_s20  ;;  %v32_v13 = vld [vmem:[#allocation2 + $0x48] sm:$0xff]  ;;  %v38_v14 = vld [vmem:[#allocation2 + $0x78] sm:$0xff] }
  0x19   :  { %49 = vrot.lane.b32.xlu0 %v25_v3, %s209_s20  ;;  %v36_v15 = vld [vmem:[#allocation2 + $0x68] sm:$0xff]  ;;  %p187_p11 = por %p186_p10, %p185_p9 }
  0x1b   :  { %p188_p12 = pnand %p187_p11, %p181_p8 }
  0x1c   :  { %57 = vrot.lane.b32.xlu1 %v33_v4, %s209_s20 }
  0x1d   :  { %55 = vrot.lane.b32.xlu0 %v31_v5, %s209_s20 }
  0x20   :  { %61 = vrot.lane.b32.xlu1 %v236_v6, %s209_s20 }
  0x21   :  { %59 = vrot.lane.b32.xlu0 %v238_v7, %s209_s20 }
  0x24   :  { %89 = vrot.lane.b32.xlu1 %v26_v8, %s209_s20 }
  0x25   :  { %87 = vrot.lane.b32.xlu0 %v24_v9, %s209_s20 }
  0x28   :  { %93 = vrot.lane.b32.xlu1 %v30_v10, %s209_s20 }
  0x29   :  { %91 = vrot.lane.b32.xlu0 %v28_v11, %s209_s20 }
  0x2c   :  { %97 = vrot.lane.b32.xlu1 %v34_v12, %s209_s20 }
  0x2d   :  { %95 = vrot.lane.b32.xlu0 %v32_v13, %s209_s20 }
  0x30   :  { %101 = vrot.lane.b32.xlu1 %v38_v14, %s209_s20 }
  0x31   :  { %99 = vrot.lane.b32.xlu0 %v36_v15, %s209_s20 }
  0x86   :  { %v52_v16 = vpop.permute.xlu1 %51 }
  0x87   :  { %v48_v17 = vpop.permute.xlu0 %47  ;;  %v73_v34 = vmax.f32 %v27_v0, %v52_v16 }
  0x88   :  { %v71_v26 = vmax.f32 %v23_v1, %v48_v17 }
  0x8a   :  { %v54_v18 = vpop.permute.xlu1 %53 }
  0x8b   :  { %v50_v19 = vpop.permute.xlu0 %49  ;;  %v74_v35 = vmax.f32 %v29_v2, %v54_v18 }
  0x8c   :  { %v72_v27 = vmax.f32 %v25_v3, %v50_v19 }
  0x8e   :  { %v58_v20 = vpop.permute.xlu1 %57 }
  0x8f   :  { %v56_v21 = vpop.permute.xlu0 %55  ;;  %v76_v42 = vmax.f32 %v33_v4, %v58_v20 }
  0x90   :  { %v75_v43 = vmax.f32 %v31_v5, %v56_v21 }
  0x92   :  { %v62_v22 = vpop.permute.xlu1 %61 }
  0x93   :  { %v60_v23 = vpop.permute.xlu0 %59  ;;  %v78_v50 = vmax.f32 %v236_v6, %v62_v22 }
  0x94   :  { %v77_v51 = vmax.f32 %v238_v7, %v60_v23 }
  0x96   :  { %v90_v24 = vpop.permute.xlu1 %89 }
  0x97   :  { %v88_v25 = vpop.permute.xlu0 %87  ;;  %v112_v28 = vmax.f32 %v26_v8, %v90_v24 }
  0x98   :  { %v111_v29 = vmax.f32 %v24_v9, %v88_v25 }
  0x99   :  { %v120_v30 = vmax.f32 %v72_v27, %v112_v28 }
  0x9a   :  { %v119_v31 = vmax.f32 %v71_v26, %v111_v29  ;;  %v94_v32 = vpop.permute.xlu1 %93 }
  0x9b   :  { %v92_v33 = vpop.permute.xlu0 %91  ;;  %129 = vst.msk [vmem:[#allocation5 + $0x8] sm:$0xff] %vm127_vm0, %v120_v30  ;;  %v114_v36 = vmax.f32 %v30_v10, %v94_v32 }
  0x9c   :  { %128 = vst.msk [vmem:[#allocation5] sm:$0xff] %vm127_vm0, %v119_v31  ;;  %v113_v37 = vmax.f32 %v28_v11, %v92_v33 }
  0x9d   :  { %v122_v38 = vmax.f32 %v74_v35, %v114_v36 }
  0x9e   :  { %v121_v39 = vmax.f32 %v73_v34, %v113_v37  ;;  %v98_v40 = vpop.permute.xlu1 %97 }
  0x9f   :  { %v96_v41 = vpop.permute.xlu0 %95  ;;  %131 = vst.msk [vmem:[#allocation5 + $0x18] sm:$0xff] %vm127_vm0, %v122_v38  ;;  %v116_v44 = vmax.f32 %v34_v12, %v98_v40 }
  0xa0   :  { %130 = vst.msk [vmem:[#allocation5 + $0x10] sm:$0xff] %vm127_vm0, %v121_v39  ;;  %v115_v45 = vmax.f32 %v32_v13, %v96_v41 }
  0xa1   :  { %v124_v46 = vmax.f32 %v76_v42, %v116_v44 }
  0xa2   :  { %v123_v47 = vmax.f32 %v75_v43, %v115_v45  ;;  %v102_v48 = vpop.permute.xlu1 %101 }
  0xa3   :  { %v100_v49 = vpop.permute.xlu0 %99  ;;  %133 = vst.msk [vmem:[#allocation5 + $0x28] sm:$0xff] %vm127_vm0, %v124_v46  ;;  %v118_v52 = vmax.f32 %v38_v14, %v102_v48 }
  0xa4   :  { %132 = vst.msk [vmem:[#allocation5 + $0x20] sm:$0xff] %vm127_vm0, %v123_v47  ;;  %v117_v53 = vmax.f32 %v36_v15, %v100_v49 }
  0xa5   :  { %v126_v54 = vmax.f32 %v78_v50, %v118_v52 }
  0xa6   :  { %v125_v55 = vmax.f32 %v77_v51, %v117_v53 }
  0xa7   :  { %135 = vst.msk [vmem:[#allocation5 + $0x38] sm:$0xff] %vm127_vm0, %v126_v54 }
  0xa8   :  { %134 = vst.msk [vmem:[#allocation5 + $0x30] sm:$0xff] %vm127_vm0, %v125_v55 }
  0xa9   :  { %191 = shalt.err (!%p188_p12)
}
  0xaa   :  { %s192_s25 = scalar_lea.hbm %s268_s1, 1024 }
  0xab   :  { %p193_p13 = scmp.ne.s32.totalorder %s268_s1, %s192_s25  ;;  %p196_p0 = scmp.lt.u32.totalorder %s192_s25, %s268_s1 }
  0xad   :  { %p198_p1 = pnand %p196_p0, %p193_p13 }
  0xaf   :  { %201 = shalt.err (!%p198_p1)
}
  0xb0   :  { %147 = dma.vmem_to_hbm [thread:$0]  %s142_s21, 1024, %s268_s1, [#allocation4], %s207_s16, %s207_s16, %s208_s17  }
  0xb1   :  { %204 = dma.done.wait [#allocation4], 1024  }
  0xb2   :  { %205 = vsyncadd [#allocation4], 4294966272 }
  0xb3   :  { %151 = vsyncpa [#allocation3], 1 }
  0xb4   :  { %152 = vsyncpa [#allocation4], 1 }

</bundles_post_ra>
